<compile_context>
chip_gen: v7x
topology: tpu7x:2x2x1
jax: 0.10.0
libtpu: 0.0.40
codegen_flags: <defaults>
</compile_context>

<pallas_src>
import functools

import jax
import jax.numpy as jnp
from jax import lax
from jax.experimental import pallas as pl
from jax.experimental.pallas import tpu as pltpu


def _adder_kernel(x_ref, h0_ref, wih_t_ref, whh_t_ref, b_ref, wfc_ref, bfc_ref,
                  out_ref, h_carry, pre_buf, hist, *, tail_len, unroll):
    """One sequence chunk of the fused tanh-RNN + Linear(H, 1) + sigmoid head.

    x_ref:     (C, F)   input chunk
    h0_ref:    (1, H)   initial hidden state (from the graph RNN)
    wih_t_ref: (F, H)   W_ih^T
    whh_t_ref: (H, H)   W_hh^T
    b_ref:     (1, H)   b_ih + b_hh
    wfc_ref:   (1, H)   fc weight row
    bfc_ref:   (1,)     fc bias (SMEM scalar)
    out_ref:   (1, C)   sigmoid(logits), lane-dense (sequence on the lane axis)
    h_carry:   (1, H)   VMEM scratch: hidden state carried across grid steps (chunks)
    pre_buf:   (C, H)   VMEM scratch: x @ W_ih^T + b (read-only in the recurrence)
    hist:      (C, H)   VMEM scratch: per-step hidden states (consumed by the fc matmul)
    tail_len:  static length of the final (possibly ragged) chunk; == C when no padding
    """
    chunk = x_ref.shape[0]

    # First chunk: seed the carried hidden state.
    @pl.when(pl.program_id(0) == 0)
    def _():
        h_carry[...] = h0_ref[...]

    # Input contribution for every timestep of this chunk in one MXU matmul.
    pre_buf[...] = (
        jnp.dot(x_ref[...], wih_t_ref[...], preferred_element_type=jnp.float32)
        + b_ref[...]
    )

    # Hoisted loop invariant.
    whh_t = whh_t_ref[...]

    def step(t, h_prev):
        pre_t = pre_buf[pl.ds(t, 1), :]                              # (1, H)
        h_new = jnp.tanh(
            pre_t + jnp.dot(h_prev, whh_t, preferred_element_type=jnp.float32)
        )
        hist[pl.ds(t, 1), :] = h_new                                 # off the h->h critical chain
        return h_new

    if tail_len == chunk:
        # All chunks are full: one static, partially-unrolled recurrence loop.
        h_carry[...] = lax.fori_loop(0, chunk, step, h_carry[...], unroll=unroll)
    else:
        # Only the last chunk is ragged; both trip counts are static (unrollable),
        # so no dead recurrence steps run over the zero-padded tail.
        last = pl.num_programs(0) - 1

        @pl.when(pl.program_id(0) != last)
        def _():
            h_carry[...] = lax.fori_loop(0, chunk, step, h_carry[...], unroll=unroll)

        @pl.when(pl.program_id(0) == last)
        def _():
            h_carry[...] = lax.fori_loop(0, tail_len, step, h_carry[...], unroll=unroll)

    # Fused fc head once per chunk on the MXU: (1, H) contracted with (C, H) on H
    # -> lane-dense (1, C) logits (same contract-last-with-last pattern as q @ k^T).
    # Rows past tail_len (padded tail) are stale-but-finite and sliced off in the wrapper.
    logits = jnp.einsum("oh,ch->oc", wfc_ref[...], hist[...],
                        preferred_element_type=jnp.float32)
    out_ref[...] = jax.nn.sigmoid(logits + bfc_ref[0])


def adder_forward(x, h, params, *, seq_chunk=512, unroll=16):
    """Adder forward pass: sigmoid(fc(RNN(x, h))) for a single (unbatched) sample."""
    x = jnp.asarray(x, jnp.float32)
    h = jnp.asarray(h, jnp.float32)
    S, F = x.shape
    H = params["w_hh"].shape[0]

    if S <= seq_chunk:
        chunk, n_chunks = S, 1
        unroll_ = True if S <= 64 else unroll       # tiny window: fully unroll
    else:
        assert seq_chunk % 128 == 0, (
            "seq_chunk must be a multiple of 128 when S > seq_chunk "
            "(lane-dense (1, chunk) output blocks)")
        chunk, n_chunks, unroll_ = seq_chunk, pl.cdiv(S, seq_chunk), unroll
    s_pad = n_chunks * chunk
    tail_len = S - (n_chunks - 1) * chunk           # static length of the final chunk
    if s_pad != S:
        # Zero-pad the tail chunk for the DMA block; padded steps are never executed.
        x = jnp.pad(x, ((0, s_pad - S), (0, 0)))

    wih_t = jnp.asarray(params["w_ih"], jnp.float32).T                      # (F, H)
    whh_t = jnp.asarray(params["w_hh"], jnp.float32).T                      # (H, H)
    b = (jnp.asarray(params["b_ih"], jnp.float32)
         + jnp.asarray(params["b_hh"], jnp.float32)).reshape(1, H)          # (1, H)
    wfc = jnp.asarray(params["w_fc"], jnp.float32).reshape(1, H)            # (1, H)
    bfc = jnp.asarray(params["b_fc"], jnp.float32).reshape(1)               # (1,) SMEM scalar

    out2d = pl.pallas_call(
        functools.partial(_adder_kernel, tail_len=tail_len, unroll=unroll_),
        out_shape=jax.ShapeDtypeStruct((1, s_pad), jnp.float32),
        grid=(n_chunks,),
        in_specs=[
            pl.BlockSpec((chunk, F), lambda i: (i, 0)),          # x chunks, auto-pipelined
            pl.BlockSpec((1, H), lambda i: (0, 0)),              # h0
            pl.BlockSpec((F, H), lambda i: (0, 0)),              # W_ih^T
            pl.BlockSpec((H, H), lambda i: (0, 0)),              # W_hh^T
            pl.BlockSpec((1, H), lambda i: (0, 0)),              # b_ih + b_hh
            pl.BlockSpec((1, H), lambda i: (0, 0)),              # fc weight row
            pl.BlockSpec(memory_space=pltpu.MemorySpace.SMEM),   # fc bias scalar
        ],
        out_specs=pl.BlockSpec((1, chunk), lambda i: (0, i)),    # lane-dense output blocks
        scratch_shapes=[
            pltpu.VMEM((1, H), jnp.float32),        # hidden state carried across chunks
            pltpu.VMEM((chunk, H), jnp.float32),    # per-chunk input pre-activations
            pltpu.VMEM((chunk, H), jnp.float32),    # per-chunk hidden-state history (fc input)
        ],
        compiler_params=pltpu.CompilerParams(
            dimension_semantics=("arbitrary",)      # chunks form a serial recurrence
        ),
    )(x, h, wih_t, whh_t, b, wfc, bfc)

    return out2d[0, :S].reshape(S, 1)


def init_params(key, node_feature_dim, hidden_dim):
    """PyTorch-shaped parameters: RNN(F -> H) and Linear(H -> 1)."""
    H = hidden_dim
    k = jax.random.split(key, 6)
    s = 1.0 / jnp.sqrt(jnp.float32(H))
    u = lambda kk, shape: jax.random.uniform(kk, shape, jnp.float32, -s, s)
    return {
        "w_ih": u(k[0], (H, node_feature_dim)),   # weight_ih_l0
        "w_hh": u(k[1], (H, H)),                  # weight_hh_l0
        "b_ih": u(k[2], (H,)),
        "b_hh": u(k[3], (H,)),
        "w_fc": u(k[4], (1, H)),                  # fc.weight
        "b_fc": u(k[5], (1,)),                    # fc.bias
    }


def adder_reference(x, h, params):
    """Pure-JAX reference of the same forward pass (for correctness check)."""
    pre = x @ params["w_ih"].T + params["b_ih"] + params["b_hh"]   # (S, H)

    def step(h_prev, pre_t):
        h_new = jnp.tanh(pre_t + h_prev @ params["w_hh"].T)
        return h_new, h_new

    _, outs = lax.scan(step, h[0], pre)
    logits = outs @ params["w_fc"].T + params["b_fc"]
    return jax.nn.sigmoid(logits)


if __name__ == "__main__":
    node_feature_dim = 8
    hidden_dim = 16
    window_size = 8

    key = jax.random.PRNGKey(0)
    kx, kh, kp, kx2 = jax.random.split(key, 4)

    x = jax.random.normal(kx, (window_size, node_feature_dim), jnp.float32)
    h = jax.random.normal(kh, (1, hidden_dim), jnp.float32)
    params = init_params(kp, node_feature_dim, hidden_dim)

    out = jax.block_until_ready(adder_forward(x, h, params))
    ref = adder_reference(x, h, params)
    assert out.shape == (window_size, 1), out.shape
    assert jnp.allclose(out, ref, atol=1e-5, rtol=1e-5), (out, ref)

    # Exercise the multi-chunk (grid-pipelined) path with a ragged final chunk as well.
    long_seq = 200
    x_long = jax.random.normal(kx2, (long_seq, node_feature_dim), jnp.float32)
    out_long = jax.block_until_ready(adder_forward(x_long, h, params, seq_chunk=128))
    ref_long = adder_reference(x_long, h, params)
    assert out_long.shape == (long_seq, 1), out_long.shape
    assert jnp.allclose(out_long, ref_long, atol=1e-4, rtol=1e-4), (out_long, ref_long)

    print("KERNEL_OK")
</pallas_src>

<mosaic_0001>
module attributes {stable_mosaic.version = 11 : i64} {
  func.func @_adder_kernel(%arg0: i32, %arg1: memref<8x8xf32, #tpu.memory_space<vmem>>, %arg2: memref<1x16xf32, #tpu.memory_space<vmem>>, %arg3: memref<8x16xf32, #tpu.memory_space<vmem>>, %arg4: memref<16x16xf32, #tpu.memory_space<vmem>>, %arg5: memref<1x16xf32, #tpu.memory_space<vmem>>, %arg6: memref<1x16xf32, #tpu.memory_space<vmem>>, %arg7: memref<1xf32, #tpu.memory_space<smem>>, %arg8: memref<1x8xf32, #tpu.memory_space<vmem>>, %arg9: memref<1x16xf32, #tpu.memory_space<vmem>>, %arg10: memref<8x16xf32, #tpu.memory_space<vmem>>, %arg11: memref<8x16xf32, #tpu.memory_space<vmem>>) attributes {dimension_semantics = [#tpu.dimension_semantics<arbitrary>], iteration_bounds = array<i64: 1>, scalar_prefetch = 0 : i64, scratch_operands = 3 : i64, tpu.core_type = #tpu.core_type<tc>, window_params = [{transform_indices = @transform_0, window_bounds = array<i64: 8, 8>}, {pipeline_mode = #tpu.pipeline_mode<synchronous>, transform_indices = @transform_1, window_bounds = array<i64: 1, 16>}, {pipeline_mode = #tpu.pipeline_mode<synchronous>, transform_indices = @transform_2, window_bounds = array<i64: 8, 16>}, {pipeline_mode = #tpu.pipeline_mode<synchronous>, transform_indices = @transform_3, window_bounds = array<i64: 16, 16>}, {pipeline_mode = #tpu.pipeline_mode<synchronous>, transform_indices = @transform_4, window_bounds = array<i64: 1, 16>}, {pipeline_mode = #tpu.pipeline_mode<synchronous>, transform_indices = @transform_5, window_bounds = array<i64: 1, 16>}, {transform_indices = @transform_6, window_bounds = array<i64: 1>}, {transform_indices = @transform_7, window_bounds = array<i64: 1, 8>}]} {
    %c0_i32 = arith.constant 0 : i32
    %0 = arith.cmpi eq, %arg0, %c0_i32 : i32
    %1 = arith.extui %0 : i1 to i32
    %c0_i32_0 = arith.constant 0 : i32
    %2 = arith.cmpi ne, %1, %c0_i32_0 : i32
    scf.if %2 {
      %c0_48 = arith.constant 0 : index
      %c0_49 = arith.constant 0 : index
      %81 = vector.load %arg2[%c0_48, %c0_49] : memref<1x16xf32, #tpu.memory_space<vmem>>, vector<1x16xf32>
      %c0_50 = arith.constant 0 : index
      %c0_51 = arith.constant 0 : index
      %82 = vector.load %arg9[%c0_50, %c0_51] : memref<1x16xf32, #tpu.memory_space<vmem>>, vector<1x16xf32>
      tpu.vector_store %arg9[%c0_50, %c0_51], %81 {strides = array<i32>} : memref<1x16xf32, #tpu.memory_space<vmem>>, vector<1x16xf32>,
    } else {
    }
    %c0 = arith.constant 0 : index
    %c0_1 = arith.constant 0 : index
    %3 = vector.load %arg1[%c0, %c0_1] : memref<8x8xf32, #tpu.memory_space<vmem>>, vector<8x8xf32>
    %c0_2 = arith.constant 0 : index
    %c0_3 = arith.constant 0 : index
    %4 = vector.load %arg3[%c0_2, %c0_3] : memref<8x16xf32, #tpu.memory_space<vmem>>, vector<8x16xf32>
    %cst = arith.constant dense<0.000000e+00> : vector<8x16xf32>
    %5 = tpu.matmul %3, %4, %cst {dimension_numbers = #tpu.dot_dimension_numbers<[1], [0], [0], [1], [0, 0, 1, 1], [], []>} : vector<8x8xf32>, vector<8x16xf32>, vector<8x16xf32> -> vector<8x16xf32>
    %c0_4 = arith.constant 0 : index
    %c0_5 = arith.constant 0 : index
    %6 = vector.load %arg5[%c0_4, %c0_5] : memref<1x16xf32, #tpu.memory_space<vmem>>, vector<1x16xf32>
    %7 = vector.broadcast %6 : vector<1x16xf32> to vector<8x16xf32>
    %8 = arith.addf %5, %7 : vector<8x16xf32>
    %c0_6 = arith.constant 0 : index
    %c0_7 = arith.constant 0 : index
    %9 = vector.load %arg10[%c0_6, %c0_7] : memref<8x16xf32, #tpu.memory_space<vmem>>, vector<8x16xf32>
    tpu.vector_store %arg10[%c0_6, %c0_7], %8 {strides = array<i32>} : memref<8x16xf32, #tpu.memory_space<vmem>>, vector<8x16xf32>,
    %c0_8 = arith.constant 0 : index
    %c0_9 = arith.constant 0 : index
    %10 = vector.load %arg4[%c0_8, %c0_9] : memref<16x16xf32, #tpu.memory_space<vmem>>, vector<16x16xf32>
    %c0_10 = arith.constant 0 : index
    %c0_11 = arith.constant 0 : index
    %11 = vector.load %arg9[%c0_10, %c0_11] : memref<1x16xf32, #tpu.memory_space<vmem>>, vector<1x16xf32>
    %c0_i32_12 = arith.constant 0 : i32
    %12 = arith.index_cast %c0_i32_12 : i32 to index
    %c0_13 = arith.constant 0 : index
    %13 = vector.load %arg10[%12, %c0_13] : memref<8x16xf32, #tpu.memory_space<vmem>>, vector<1x16xf32>
    %cst_14 = arith.constant dense<0.000000e+00> : vector<1x16xf32>
    %14 = tpu.matmul %11, %10, %cst_14 {dimension_numbers = #tpu.dot_dimension_numbers<[1], [0], [0], [1], [0, 0, 1, 1], [], []>} : vector<1x16xf32>, vector<16x16xf32>, vector<1x16xf32> -> vector<1x16xf32>
    %15 = arith.addf %13, %14 : vector<1x16xf32>
    %16 = math.tanh %15 : vector<1x16xf32>
    %17 = arith.index_cast %c0_i32_12 : i32 to index
    %c0_15 = arith.constant 0 : index
    %18 = vector.load %arg11[%17, %c0_15] : memref<8x16xf32, #tpu.memory_space<vmem>>, vector<1x16xf32>
    tpu.vector_store %arg11[%17, %c0_15], %16 {strides = array<i32>} : memref<8x16xf32, #tpu.memory_space<vmem>>, vector<1x16xf32>,
    %c1_i32 = arith.constant 1 : i32
    %19 = arith.index_cast %c1_i32 : i32 to index
    %c0_16 = arith.constant 0 : index
    %20 = vector.load %arg10[%19, %c0_16] : memref<8x16xf32, #tpu.memory_space<vmem>>, vector<1x16xf32>
    %cst_17 = arith.constant dense<0.000000e+00> : vector<1x16xf32>
    %21 = tpu.matmul %16, %10, %cst_17 {dimension_numbers = #tpu.dot_dimension_numbers<[1], [0], [0], [1], [0, 0, 1, 1], [], []>} : vector<1x16xf32>, vector<16x16xf32>, vector<1x16xf32> -> vector<1x16xf32>
    %22 = arith.addf %20, %21 : vector<1x16xf32>
    %23 = math.tanh %22 : vector<1x16xf32>
    %24 = arith.index_cast %c1_i32 : i32 to index
    %c0_18 = arith.constant 0 : index
    %25 = vector.load %arg11[%24, %c0_18] : memref<8x16xf32, #tpu.memory_space<vmem>>, vector<1x16xf32>
    tpu.vector_store %arg11[%24, %c0_18], %23 {strides = array<i32>} : memref<8x16xf32, #tpu.memory_space<vmem>>, vector<1x16xf32>,
    %c2_i32 = arith.constant 2 : i32
    %26 = arith.index_cast %c2_i32 : i32 to index
    %c0_19 = arith.constant 0 : index
    %27 = vector.load %arg10[%26, %c0_19] : memref<8x16xf32, #tpu.memory_space<vmem>>, vector<1x16xf32>
    %cst_20 = arith.constant dense<0.000000e+00> : vector<1x16xf32>
    %28 = tpu.matmul %23, %10, %cst_20 {dimension_numbers = #tpu.dot_dimension_numbers<[1], [0], [0], [1], [0, 0, 1, 1], [], []>} : vector<1x16xf32>, vector<16x16xf32>, vector<1x16xf32> -> vector<1x16xf32>
    %29 = arith.addf %27, %28 : vector<1x16xf32>
    %30 = math.tanh %29 : vector<1x16xf32>
    %31 = arith.index_cast %c2_i32 : i32 to index
    %c0_21 = arith.constant 0 : index
    %32 = vector.load %arg11[%31, %c0_21] : memref<8x16xf32, #tpu.memory_space<vmem>>, vector<1x16xf32>
    tpu.vector_store %arg11[%31, %c0_21], %30 {strides = array<i32>} : memref<8x16xf32, #tpu.memory_space<vmem>>, vector<1x16xf32>,
    %c3_i32 = arith.constant 3 : i32
    %33 = arith.index_cast %c3_i32 : i32 to index
    %c0_22 = arith.constant 0 : index
    %34 = vector.load %arg10[%33, %c0_22] : memref<8x16xf32, #tpu.memory_space<vmem>>, vector<1x16xf32>
    %cst_23 = arith.constant dense<0.000000e+00> : vector<1x16xf32>
    %35 = tpu.matmul %30, %10, %cst_23 {dimension_numbers = #tpu.dot_dimension_numbers<[1], [0], [0], [1], [0, 0, 1, 1], [], []>} : vector<1x16xf32>, vector<16x16xf32>, vector<1x16xf32> -> vector<1x16xf32>
    %36 = arith.addf %34, %35 : vector<1x16xf32>
    %37 = math.tanh %36 : vector<1x16xf32>
    %38 = arith.index_cast %c3_i32 : i32 to index
    %c0_24 = arith.constant 0 : index
    %39 = vector.load %arg11[%38, %c0_24] : memref<8x16xf32, #tpu.memory_space<vmem>>, vector<1x16xf32>
    tpu.vector_store %arg11[%38, %c0_24], %37 {strides = array<i32>} : memref<8x16xf32, #tpu.memory_space<vmem>>, vector<1x16xf32>,
    %c4_i32 = arith.constant 4 : i32
    %40 = arith.index_cast %c4_i32 : i32 to index
    %c0_25 = arith.constant 0 : index
    %41 = vector.load %arg10[%40, %c0_25] : memref<8x16xf32, #tpu.memory_space<vmem>>, vector<1x16xf32>
    %cst_26 = arith.constant dense<0.000000e+00> : vector<1x16xf32>
    %42 = tpu.matmul %37, %10, %cst_26 {dimension_numbers = #tpu.dot_dimension_numbers<[1], [0], [0], [1], [0, 0, 1, 1], [], []>} : vector<1x16xf32>, vector<16x16xf32>, vector<1x16xf32> -> vector<1x16xf32>
    %43 = arith.addf %41, %42 : vector<1x16xf32>
    %44 = math.tanh %43 : vector<1x16xf32>
    %45 = arith.index_cast %c4_i32 : i32 to index
    %c0_27 = arith.constant 0 : index
    %46 = vector.load %arg11[%45, %c0_27] : memref<8x16xf32, #tpu.memory_space<vmem>>, vector<1x16xf32>
    tpu.vector_store %arg11[%45, %c0_27], %44 {strides = array<i32>} : memref<8x16xf32, #tpu.memory_space<vmem>>, vector<1x16xf32>,
    %c5_i32 = arith.constant 5 : i32
    %47 = arith.index_cast %c5_i32 : i32 to index
    %c0_28 = arith.constant 0 : index
    %48 = vector.load %arg10[%47, %c0_28] : memref<8x16xf32, #tpu.memory_space<vmem>>, vector<1x16xf32>
    %cst_29 = arith.constant dense<0.000000e+00> : vector<1x16xf32>
    %49 = tpu.matmul %44, %10, %cst_29 {dimension_numbers = #tpu.dot_dimension_numbers<[1], [0], [0], [1], [0, 0, 1, 1], [], []>} : vector<1x16xf32>, vector<16x16xf32>, vector<1x16xf32> -> vector<1x16xf32>
    %50 = arith.addf %48, %49 : vector<1x16xf32>
    %51 = math.tanh %50 : vector<1x16xf32>
    %52 = arith.index_cast %c5_i32 : i32 to index
    %c0_30 = arith.constant 0 : index
    %53 = vector.load %arg11[%52, %c0_30] : memref<8x16xf32, #tpu.memory_space<vmem>>, vector<1x16xf32>
    tpu.vector_store %arg11[%52, %c0_30], %51 {strides = array<i32>} : memref<8x16xf32, #tpu.memory_space<vmem>>, vector<1x16xf32>,
    %c6_i32 = arith.constant 6 : i32
    %54 = arith.index_cast %c6_i32 : i32 to index
    %c0_31 = arith.constant 0 : index
    %55 = vector.load %arg10[%54, %c0_31] : memref<8x16xf32, #tpu.memory_space<vmem>>, vector<1x16xf32>
    %cst_32 = arith.constant dense<0.000000e+00> : vector<1x16xf32>
    %56 = tpu.matmul %51, %10, %cst_32 {dimension_numbers = #tpu.dot_dimension_numbers<[1], [0], [0], [1], [0, 0, 1, 1], [], []>} : vector<1x16xf32>, vector<16x16xf32>, vector<1x16xf32> -> vector<1x16xf32>
    %57 = arith.addf %55, %56 : vector<1x16xf32>
    %58 = math.tanh %57 : vector<1x16xf32>
    %59 = arith.index_cast %c6_i32 : i32 to index
    %c0_33 = arith.constant 0 : index
    %60 = vector.load %arg11[%59, %c0_33] : memref<8x16xf32, #tpu.memory_space<vmem>>, vector<1x16xf32>
    tpu.vector_store %arg11[%59, %c0_33], %58 {strides = array<i32>} : memref<8x16xf32, #tpu.memory_space<vmem>>, vector<1x16xf32>,
    %c7_i32 = arith.constant 7 : i32
    %61 = arith.index_cast %c7_i32 : i32 to index
    %c0_34 = arith.constant 0 : index
    %62 = vector.load %arg10[%61, %c0_34] : memref<8x16xf32, #tpu.memory_space<vmem>>, vector<1x16xf32>
    %cst_35 = arith.constant dense<0.000000e+00> : vector<1x16xf32>
    %63 = tpu.matmul %58, %10, %cst_35 {dimension_numbers = #tpu.dot_dimension_numbers<[1], [0], [0], [1], [0, 0, 1, 1], [], []>} : vector<1x16xf32>, vector<16x16xf32>, vector<1x16xf32> -> vector<1x16xf32>
    %64 = arith.addf %62, %63 : vector<1x16xf32>
    %65 = math.tanh %64 : vector<1x16xf32>
    %66 = arith.index_cast %c7_i32 : i32 to index
    %c0_36 = arith.constant 0 : index
    %67 = vector.load %arg11[%66, %c0_36] : memref<8x16xf32, #tpu.memory_space<vmem>>, vector<1x16xf32>
    tpu.vector_store %arg11[%66, %c0_36], %65 {strides = array<i32>} : memref<8x16xf32, #tpu.memory_space<vmem>>, vector<1x16xf32>,
    %c8_i32 = arith.constant 8 : i32
    %c0_37 = arith.constant 0 : index
    %c0_38 = arith.constant 0 : index
    %68 = vector.load %arg9[%c0_37, %c0_38] : memref<1x16xf32, #tpu.memory_space<vmem>>, vector<1x16xf32>
    tpu.vector_store %arg9[%c0_37, %c0_38], %65 {strides = array<i32>} : memref<1x16xf32, #tpu.memory_space<vmem>>, vector<1x16xf32>,
    %c0_39 = arith.constant 0 : index
    %c0_40 = arith.constant 0 : index
    %69 = vector.load %arg6[%c0_39, %c0_40] : memref<1x16xf32, #tpu.memory_space<vmem>>, vector<1x16xf32>
    %c0_41 = arith.constant 0 : index
    %c0_42 = arith.constant 0 : index
    %70 = vector.load %arg11[%c0_41, %c0_42] : memref<8x16xf32, #tpu.memory_space<vmem>>, vector<8x16xf32>
    "tpu.trace_start"() <{level = 10 : i32, message = "oh,ch->oc"}> : () -> ()
    %cst_43 = arith.constant dense<0.000000e+00> : vector<1x8xf32>
    %71 = tpu.matmul %69, %70, %cst_43 {dimension_numbers = #tpu.dot_dimension_numbers<[1], [1], [0], [0], [0, 0, 1, 0], [], []>} : vector<1x16xf32>, vector<8x16xf32>, vector<1x8xf32> -> vector<1x8xf32>
    "tpu.trace_stop"() : () -> ()
    %c0_44 = arith.constant 0 : index
    %72 = memref.load %arg7[%c0_44] : memref<1xf32, #tpu.memory_space<smem>>
    %73 = vector.broadcast %72 : f32 to vector<1x8xf32>
    %74 = arith.addf %71, %73 : vector<1x8xf32>
    %75 = arith.negf %74 : vector<1x8xf32>
    %76 = math.exp %75 : vector<1x8xf32>
    %cst_45 = arith.constant 1.000000e+00 : f32
    %77 = vector.broadcast %cst_45 : f32 to vector<1x8xf32>
    %78 = arith.addf %77, %76 : vector<1x8xf32>
    %79 = arith.divf %77, %78 : vector<1x8xf32>
    %c0_46 = arith.constant 0 : index
    %c0_47 = arith.constant 0 : index
    %80 = vector.load %arg8[%c0_46, %c0_47] : memref<1x8xf32, #tpu.memory_space<vmem>>, vector<1x8xf32>
    tpu.vector_store %arg8[%c0_46, %c0_47], %79 {strides = array<i32>} : memref<1x8xf32, #tpu.memory_space<vmem>>, vector<1x8xf32>,
    return
  }
  func.func @transform_0(%arg0: i32) -> (i32, i32) {
    %c0_i32 = arith.constant 0 : i32
    %c0_i32_0 = arith.constant 0 : i32
    return %arg0, %c0_i32 : i32, i32
  }
  func.func @transform_1(%arg0: i32) -> (i32, i32) {
    %c0_i32 = arith.constant 0 : i32
    %c0_i32_0 = arith.constant 0 : i32
    %c0_i32_1 = arith.constant 0 : i32
    return %c0_i32, %c0_i32_0 : i32, i32
  }
  func.func @transform_2(%arg0: i32) -> (i32, i32) {
    %c0_i32 = arith.constant 0 : i32
    %c0_i32_0 = arith.constant 0 : i32
    %c0_i32_1 = arith.constant 0 : i32
    return %c0_i32, %c0_i32_0 : i32, i32
  }
  func.func @transform_3(%arg0: i32) -> (i32, i32) {
    %c0_i32 = arith.constant 0 : i32
    %c0_i32_0 = arith.constant 0 : i32
    %c0_i32_1 = arith.constant 0 : i32
    return %c0_i32, %c0_i32_0 : i32, i32
  }
  func.func @transform_4(%arg0: i32) -> (i32, i32) {
    %c0_i32 = arith.constant 0 : i32
    %c0_i32_0 = arith.constant 0 : i32
    %c0_i32_1 = arith.constant 0 : i32
    return %c0_i32, %c0_i32_0 : i32, i32
  }
  func.func @transform_5(%arg0: i32) -> (i32, i32) {
    %c0_i32 = arith.constant 0 : i32
    %c0_i32_0 = arith.constant 0 : i32
    %c0_i32_1 = arith.constant 0 : i32
    return %c0_i32, %c0_i32_0 : i32, i32
  }
  func.func @transform_6(%arg0: i32) -> i32 {
    %c0_i32 = arith.constant 0 : i32
    %c0_i32_0 = arith.constant 0 : i32
    return %c0_i32 : i32
  }
  func.func @transform_7(%arg0: i32) -> (i32, i32) {
    %c0_i32 = arith.constant 0 : i32
    %c0_i32_0 = arith.constant 0 : i32
    return %c0_i32, %arg0 : i32, i32
  }
}

</mosaic_0001>

<bundles_post_ra>
// kernel: tpu_custom_call.1
= control target key start
LH: loop header
LB: loop body
LE: loop exit
PB: predicated region body
PF: predicated region fallthrough
CT: control target
= control target key end

     0   :  { %13 = vsyncpa [#allocation7], 0  ;;  %s1269_s0 = inlined_call_operand.hbm [shape: f32[8,8], index: 0, kind: input, shape index: {}]   ;;  %s1270_s1 = inlined_call_operand.vmem [shape: f32[1,16], index: 1, kind: input, shape index: {}]   ;;  %s1271_s2 = inlined_call_operand.vmem [shape: f32[8,16], index: 2, kind: input, shape index: {}]   ;;  %s1272_s3 = inlined_call_operand.hbm [shape: f32[16,16], index: 3, kind: input, shape index: {}]   ;;  %s1273_s4 = inlined_call_operand.vmem [shape: f32[1,16], index: 4, kind: input, shape index: {}]   ;;  %s1274_s5 = inlined_call_operand.vmem [shape: f32[1,16], index: 5, kind: input, shape index: {}]   ;;  %s1275_s6 = inlined_call_operand.<no memory space> [shape: f32[1], index: 6, kind: input, shape index: {}]   ;;  %s1276_s7 = inlined_call_operand.hbm [shape: f32[1,8], index: 7, kind: output, shape index: {}]  }
   0x1   :  { %14 = vsyncpa [#allocation10], 0 }
   0x2   :  { %15 = vsyncpa [#allocation8], 0  ;;  %s1102_s24 = smov [#allocation6]   ;;  %s1103_s26 = smov [#allocation9]  }
   0x3   :  { %s22_s25 = sshll.u32 %s1102_s24, 4  ;;  %s35_s27 = sshll.u32 %s1103_s26, 4  ;;  %s23_s25 = int_to_ptr.vmem [resolvable:$true] %s22_s25  ;;  %s1150_s27 = int_to_ptr.vmem [resolvable:$true] %s35_s27 }
   0x4   :  { %s1030_s30 = scalar_lea.hbm %s1269_s0, 128 }
   0x5   :  { %p1031_p0 = scmp.ne.s32.totalorder %s1269_s0, %s1030_s30  ;;  %p1034_p1 = scmp.lt.u32.totalorder %s1030_s30, %s1269_s0 }
   0x7   :  { %p1036_p2 = pnand %p1034_p1, %p1031_p0 }
   0x9   :  { %1039 = shalt.err (!%p1036_p2)
}
   0xa   :  { %s1040_s12 = scalar_lea.vmem %s23_s25, 128  ;;  %p1045_p4 = scmp.lt.s32.totalorder %s23_s25, %s23_s25 }
   0xb   :  { %p1041_p3 = scmp.ne.s32.totalorder %s23_s25, %s1040_s12  ;;  %p1046_p5 = scmp.lt.s32.totalorder %s1040_s12, %s1040_s12 }
   0xd   :  { %p1047_p6 = por %p1046_p5, %p1045_p4 }
   0xf   :  { %p1048_p7 = pnand %p1047_p6, %p1041_p3 }
  0x11   :  { %1051 = shalt.err (!%p1048_p7)
}
  0x12   :  { %25 = dma.hbm_to_vmem [thread:$0]  %s1269_s0, 128, %s23_s25, [#allocation7]  }
  0x13   :  { %s1052_s17 = scalar_lea.hbm %s1272_s3, 256 }
  0x14   :  { %p1053_p8 = scmp.ne.s32.totalorder %s1272_s3, %s1052_s17  ;;  %p1056_p9 = scmp.lt.u32.totalorder %s1052_s17, %s1272_s3 }
  0x16   :  { %p1058_p10 = pnand %p1056_p9, %p1053_p8 }
  0x18   :  { %1061 = shalt.err (!%p1058_p10)
}
  0x19   :  { %s1062_s22 = scalar_lea.vmem %s1150_s27, 256  ;;  %p1067_p12 = scmp.lt.s32.totalorder %s1150_s27, %s1150_s27 }
  0x1a   :  { %p1063_p11 = scmp.ne.s32.totalorder %s1150_s27, %s1062_s22  ;;  %p1068_p13 = scmp.lt.s32.totalorder %s1062_s22, %s1062_s22 }
  0x1c   :  { %p1069_p0 = por %p1068_p13, %p1067_p12 }
  0x1e   :  { %p1070_p1 = pnand %p1069_p0, %p1063_p11 }
  0x20   :  { %1073 = shalt.err (!%p1070_p1)
}
  0x21   :  { %s1104_s0 = smov 128   ;;  %s1105_s23 = smov 8  }
  0x22   :  { %41 = dma.hbm_to_vmem [thread:$0]  %s1272_s3, 256, %s1150_s27, [#allocation10], %s1104_s0, %s1104_s0, %s1105_s23  }
  0x23   :  { %1096 = dma.done.wait [#allocation7], 128  }
  0x24   :  { %1097 = vsyncadd [#allocation7], 4294967168 }
  0x25   :  { %1098 = dma.done.wait [#allocation10], 256  }
  0x26   :  { %1099 = vsyncadd [#allocation10], 4294967040  ;;  %v1106_v0 = vmov 0.0   ;;  %vm1107_vm0 = vmmov 0   ;;  %v1108_v1 = vmov 0.0|0.0   ;;  %vm70_vm1 = vcmask 64512  }
  0x27   :  { %912 = vmatprep.subr.mxu0 %v1106_v0  ;;  %914 = vmatprep.mubr.msk.f32.mxu0 %vm1107_vm0, %v1106_v0  ;;  %vm59_vm2 = vcmask 122880   ;;  %v62_v2 = vld [vmem:[%s1271_s2] sm:$0xff]  ;;  %v61_v3 = vld [vmem:[#allocation6] sm:$0xff]  ;;  %vm144_vm3 = vcmask 130048   ;;  %v770_v55 = vstv %s1275_s6  ;;  %s1109_s9 = smov [#allocation11]   ;;  %vm853_vm4 = vcmask 57344  }
  0x28   :  { %978 = vmatprep.subr.bf16.mxu1 %v1108_v1  ;;  %921 = vmatprep.mubr.msk.f32.mxu1 %vm1107_vm0, %v1106_v0  ;;  %v146_v4 = vld [vmem:[#allocation9] sm:$0xff]  ;;  %v147_v5 = vld [vmem:[#allocation9 + $0x8] sm:$0xff]  ;;  %s861_s10 = sshll.u32 %s1109_s9, 4  ;;  %s862_s10 = int_to_ptr.vmem [resolvable:$true] %s861_s10 }
  0x29   :  { %913 = vmatpush3.msra.mxu0 %v62_v2  ;;  %v58_v6 = vld [vmem:[%s1270_s1] sm:$0x1]  ;;  %v1193_v7 = vpack.c.bf16 %v147_v5, %v146_v4  ;;  %s1078_s11 = scalar_lea.vmem %s862_s10, 32  ;;  %p1079_p3 = scmp.lt.s32.totalorder %s862_s10, %s862_s10 }
  0x2a   :  { %915 = vmatmul.mubr.msk.f32.vlgmr.msra.gmra.mrb[0].mxu0 %vm70_vm1, %v61_v3  ;;  %60 = vst.msk [vmem:[#allocation2] sm:$0x1] %vm59_vm2, %v58_v6  ;;  %981 = vmatprep.subr.bf16.mxu0 %v1108_v1  ;;  %v871_v9 = vld [vmem:[%s1273_s4] ss:$0 sm:$0xff] }
  0x2b   :  { %928 = vmatprep.mubr.msk.f32.mxu0 %vm1107_vm0, %v1106_v0  ;;  %980 = vmatpush3.bf16.msra.mxu1 %v1193_v7  ;;  %v767_v54 = vld [vmem:[%s1274_s5] sm:$0x1]  ;;  %s1074_s5 = scalar_lea.vmem %s862_s10, 16 }
  0x2c   :  { %983 = vmatpush3.bf16.msra.mxu0 %v1193_v7  ;;  %984 = vmatprep.subr.bf16.mxu1 %v1108_v1  ;;  %p1075_p2 = scmp.ne.s32.totalorder %s862_s10, %s1074_s5  ;;  %p1080_p4 = scmp.lt.s32.totalorder %s1078_s11, %s1074_s5 }
  0x2d   :  { %987 = vmatprep.subr.bf16.mxu0 %v1108_v1 }
  0x2e   :  { %p1081_p5 = por %p1080_p4, %p1079_p3 }
  0x30   :  { %p1082_p6 = pnand %p1081_p5, %p1075_p2 }
  0x31   :  { %v148_v8 = vld [vmem:[#allocation2] sm:$0x1] }
  0x32   :  { %922 = vmatmul.mubr.msk.f32.vlgmr.msra.gmra.mrb[0].mxu1 %vm144_vm3, %v148_v8 }
  0x33   :  { %986 = vmatpush3.bf16.msra.mxu1 %v1193_v7  ;;  %935 = vmatprep.mubr.msk.f32.mxu1 %vm1107_vm0, %v1106_v0 }
  0x34   :  { %990 = vmatprep.subr.bf16.mxu1 %v1108_v1 }
  0xfd   :  { %v140_v10 = vpop.f32.mrb[0].mxu0 }
  0xfe   :  { %v141_v11 = vadd.f32 %v871_v9, %v140_v10  ;;  %v916_v12 = vpop.f32.mrb[1].mxu0 }
 0x100   :  { %145 = vst.msk [vmem:[#allocation3] sm:$0xff] %vm144_vm3, %v141_v11 }
 0x105   :  { %v219_v13 = vpop.f32.mrb[0].mxu1 }
 0x106   :  { %v923_v14 = vpop.f32.mrb[1].mxu1 }
 0x107   :  { %v149_v15 = vld [vmem:[#allocation3] sm:$0x1]  ;;  %v227_v18 = vld [vmem:[#allocation3 + $0x1] sm:$0x1]  ;;  %v304_v23 = vld [vmem:[#allocation3 + $0x2] sm:$0x1] }
 0x108   :  { %v223_v16 = vadd.f32 %v219_v13, %v149_v15  ;;  %v381_v28 = vld [vmem:[#allocation3 + $0x3] sm:$0x1]  ;;  %v458_v33 = vld [vmem:[#allocation3 + $0x4] sm:$0x1]  ;;  %v535_v38 = vld [vmem:[#allocation3 + $0x5] sm:$0x1] }
 0x109   :  { %v612_v43 = vld [vmem:[#allocation3 + $0x6] sm:$0x1]  ;;  %v689_v48 = vld [vmem:[#allocation3 + $0x7] sm:$0x1] }
 0x10a   :  { %1010 = vtanh.f32 %v223_v16 }
 0x114   :  { %v1011_v17 = vpop.eup %1010 }
 0x115   :  { %226 = vst.msk [vmem:[#allocation4] sm:$0x1] %vm59_vm2, %v1011_v17  ;;  %929 = vmatmul.mubr.msk.f32.vlgmr.msra.gmra.mrb[2].mxu0 %vm144_vm3, %v1011_v17 }
 0x116   :  { %989 = vmatpush3.bf16.msra.mxu0 %v1193_v7  ;;  %942 = vmatprep.mubr.msk.f32.mxu0 %vm1107_vm0, %v1106_v0 }
 0x117   :  { %993 = vmatprep.subr.bf16.mxu0 %v1108_v1 }
 0x1e8   :  { %v297_v19 = vpop.f32.mrb[2].mxu0 }
 0x1e9   :  { %v301_v20 = vadd.f32 %v297_v19, %v227_v18  ;;  %v930_v21 = vpop.f32.mrb[3].mxu0 }
 0x1eb   :  { %1012 = vtanh.f32 %v301_v20 }
 0x1f5   :  { %v1013_v22 = vpop.eup %1012 }
 0x1f6   :  { %303 = vst.msk [vmem:[#allocation4 + $0x1] sm:$0x1] %vm59_vm2, %v1013_v22  ;;  %936 = vmatmul.mubr.msk.f32.vlgmr.msra.gmra.mrb[2].mxu1 %vm144_vm3, %v1013_v22 }
 0x1f7   :  { %992 = vmatpush3.bf16.msra.mxu1 %v1193_v7  ;;  %949 = vmatprep.mubr.msk.f32.mxu1 %vm1107_vm0, %v1106_v0 }
 0x1f8   :  { %996 = vmatprep.subr.bf16.mxu1 %v1108_v1 }
 0x2c9   :  { %v374_v24 = vpop.f32.mrb[2].mxu1 }
 0x2ca   :  { %v378_v25 = vadd.f32 %v374_v24, %v304_v23  ;;  %v937_v26 = vpop.f32.mrb[3].mxu1 }
 0x2cc   :  { %1014 = vtanh.f32 %v378_v25 }
 0x2d6   :  { %v1015_v27 = vpop.eup %1014 }
 0x2d7   :  { %380 = vst.msk [vmem:[#allocation4 + $0x2] sm:$0x1] %vm59_vm2, %v1015_v27  ;;  %943 = vmatmul.mubr.msk.f32.vlgmr.msra.gmra.mrb[4].mxu0 %vm144_vm3, %v1015_v27 }
 0x2d8   :  { %995 = vmatpush3.bf16.msra.mxu0 %v1193_v7  ;;  %956 = vmatprep.mubr.msk.f32.mxu0 %vm1107_vm0, %v1106_v0 }
 0x2d9   :  { %999 = vmatprep.subr.bf16.mxu0 %v1108_v1 }
 0x3aa   :  { %v451_v29 = vpop.f32.mrb[4].mxu0 }
 0x3ab   :  { %v455_v30 = vadd.f32 %v451_v29, %v381_v28  ;;  %v944_v31 = vpop.f32.mrb[5].mxu0 }
 0x3ad   :  { %1016 = vtanh.f32 %v455_v30 }
 0x3b7   :  { %v1017_v32 = vpop.eup %1016 }
 0x3b8   :  { %457 = vst.msk [vmem:[#allocation4 + $0x3] sm:$0x1] %vm59_vm2, %v1017_v32  ;;  %950 = vmatmul.mubr.msk.f32.vlgmr.msra.gmra.mrb[4].mxu1 %vm144_vm3, %v1017_v32 }
 0x3b9   :  { %998 = vmatpush3.bf16.msra.mxu1 %v1193_v7  ;;  %963 = vmatprep.mubr.msk.f32.mxu1 %vm1107_vm0, %v1106_v0 }
 0x3ba   :  { %973 = vmatprep.subr.mxu1 %v1106_v0 }
 0x48b   :  { %v528_v34 = vpop.f32.mrb[4].mxu1 }
 0x48c   :  { %v532_v35 = vadd.f32 %v528_v34, %v458_v33  ;;  %v951_v36 = vpop.f32.mrb[5].mxu1 }
 0x48e   :  { %1018 = vtanh.f32 %v532_v35 }
 0x498   :  { %v1019_v37 = vpop.eup %1018 }
 0x499   :  { %534 = vst.msk [vmem:[#allocation4 + $0x4] sm:$0x1] %vm59_vm2, %v1019_v37  ;;  %957 = vmatmul.mubr.msk.f32.vlgmr.msra.gmra.mrb[6].mxu0 %vm144_vm3, %v1019_v37 }
 0x49a   :  { %1001 = vmatpush3.bf16.msra.mxu0 %v1193_v7  ;;  %970 = vmatprep.mubr.msk.f32.mxu0 %vm1107_vm0, %v1106_v0 }
 0x56c   :  { %v605_v39 = vpop.f32.mrb[6].mxu0 }
 0x56d   :  { %v609_v40 = vadd.f32 %v605_v39, %v535_v38  ;;  %v958_v41 = vpop.f32.mrb[7].mxu0 }
 0x56f   :  { %1020 = vtanh.f32 %v609_v40 }
 0x579   :  { %v1021_v42 = vpop.eup %1020 }
 0x57a   :  { %611 = vst.msk [vmem:[#allocation4 + $0x5] sm:$0x1] %vm59_vm2, %v1021_v42  ;;  %964 = vmatmul.mubr.msk.f32.vlgmr.msra.gmra.mrb[6].mxu1 %vm144_vm3, %v1021_v42 }
 0x57b   :  { %975 = vmatprep.mubr.msk.f32.mxu1 %vm1107_vm0, %v1106_v0 }
 0x64d   :  { %v682_v44 = vpop.f32.mrb[6].mxu1 }
 0x64e   :  { %v686_v45 = vadd.f32 %v682_v44, %v612_v43  ;;  %v965_v46 = vpop.f32.mrb[7].mxu1 }
 0x650   :  { %1022 = vtanh.f32 %v686_v45 }
 0x65a   :  { %v1023_v47 = vpop.eup %1022 }
 0x65b   :  { %688 = vst.msk [vmem:[#allocation4 + $0x6] sm:$0x1] %vm59_vm2, %v1023_v47  ;;  %971 = vmatmul.mubr.msk.f32.vlgmr.msra.gmra.mrb[8].mxu0 %vm144_vm3, %v1023_v47 }
 0x72e   :  { %v759_v49 = vpop.f32.mrb[8].mxu0 }
 0x72f   :  { %v763_v50 = vadd.f32 %v759_v49, %v689_v48  ;;  %v972_v51 = vpop.f32.mrb[9].mxu0 }
 0x731   :  { %1024 = vtanh.f32 %v763_v50 }
 0x73b   :  { %v1025_v52 = vpop.eup %1024 }
 0x73c   :  { %765 = vst.msk [vmem:[#allocation4 + $0x7] sm:$0x1] %vm59_vm2, %v1025_v52  ;;  %766 = vst.msk [vmem:[#allocation2] sm:$0x1] %vm59_vm2, %v1025_v52 }
 0x743   :  { %v768_v53 = vld [vmem:[#allocation4] sm:$0xff] }
 0x744   :  { %974 = vmatpush3.xpose.msk.msra.mxu1 %vm144_vm3, %v768_v53 }
 0x747   :  { %976 = vmatmul.mubr.msk.f32.vlgmr.msra.gmra.mrb[8].mxu1 %vm144_vm3, %v767_v54 }
 0x81a   :  { %v843_v56 = vpop.f32.mrb[8].mxu1 }
 0x81b   :  { %v844_v57 = vadd.f32 %v843_v56, %v770_v55  ;;  %v977_v58 = vpop.f32.mrb[9].mxu1 }
 0x81d   :  { %v883_v59 = vmul.f32 -1.442695, %v844_v57 }
 0x81f   :  { %1026 = vpow2.f32 %v883_v59 }
 0x829   :  { %v1027_v60 = vpop.eup %1026 }
 0x82a   :  { %v850_v61 = vadd.f32 1.0, %v1027_v60 }
 0x82c   :  { %1028 = vrcp.f32 %v850_v61 }
 0x836   :  { %v1029_v62 = vpop.eup %1028 }
 0x837   :  { %854 = vst.msk [vmem:[#allocation11] sm:$0x1] %vm853_vm4, %v1029_v62 }
 0x838   :  { %1085 = shalt.err (!%p1082_p6)
}
 0x839   :  { %s1086_s13 = scalar_lea.hbm %s1276_s7, 16 }
 0x83a   :  { %p1087_p7 = scmp.ne.s32.totalorder %s1276_s7, %s1086_s13  ;;  %p1090_p8 = scmp.lt.u32.totalorder %s1086_s13, %s1276_s7 }
 0x83c   :  { %p1092_p9 = pnand %p1090_p8, %p1087_p7 }
 0x83e   :  { %1095 = shalt.err (!%p1092_p9)
}
 0x83f   :  { %864 = dma.vmem_to_hbm [thread:$0]  %s862_s10, 16, %s1276_s7, [#allocation8]  }
 0x840   :  { %1100 = dma.done.wait [#allocation8], 16  }
 0x841   :  { %1101 = vsyncadd [#allocation8], 4294967280 }
 0x842   :  { %868 = vsyncpa [#allocation7], 1 }
 0x843   :  { %869 = vsyncpa [#allocation10], 1 }
 0x844   :  { %870 = vsyncpa [#allocation8], 1 }

</bundles_post_ra>
